<compile_context>
chip_gen: v7x
topology: tpu7x:2x2x1
jax: 0.10.0
libtpu: 0.0.40
codegen_flags: <defaults>
</compile_context>

<pallas_src>
import functools

import jax
import jax.numpy as jnp
from jax.experimental import pallas as pl
from jax.experimental.pallas import tpu as pltpu


def _round_up(x, m):
    return ((x + m - 1) // m) * m


def _mlp_kernel(x_ref, wgu_ref, wd_ref, o_ref, acc_ref, *, inter_tile):
    # x_ref:   (TM, H)        token tile (constant across the k axis)
    # wgu_ref: (H, 2*TI)      fused [gate | up] weight tile for inter-chunk k
    # wd_ref:  (TI, H)        down-proj weight tile for inter-chunk k
    # o_ref:   (TM, H)        output tile (resident across the k axis)
    # acc_ref: (TM, H) f32    VMEM accumulator scratch
    k = pl.program_id(1)

    @pl.when(k == 0)
    def _():
        acc_ref[...] = jnp.zeros_like(acc_ref)

    x = x_ref[...]

    # One fused MXU matmul for gate+up, f32 accumulation.
    gu = jnp.dot(x, wgu_ref[...], preferred_element_type=jnp.float32)  # (TM, 2*TI)
    g = gu[:, :inter_tile]
    u = gu[:, inter_tile:]

    # SiLU (config.hidden_act == "silu") fused elementwise; sigmoid goes to EUP.
    h = (g * jax.nn.sigmoid(g)) * u

    # Partial down projection, accumulated over intermediate tiles.
    acc_ref[...] += jnp.dot(
        h.astype(wd_ref.dtype), wd_ref[...], preferred_element_type=jnp.float32
    )

    @pl.when(k == pl.num_programs(1) - 1)
    def _():
        o_ref[...] = acc_ref[...].astype(o_ref.dtype)


@functools.partial(jax.jit, static_argnames=("block_tokens", "block_inter"))
def bailing_moe_mlp(x, w_gate_t, w_up_t, w_down_t, *, block_tokens=128, block_inter=512):
    """x: [..., hidden] -> [..., hidden]."""
    orig_shape = x.shape
    hidden = orig_shape[-1]
    inter = w_gate_t.shape[1]

    x2d = x.reshape(-1, hidden)
    tokens = x2d.shape[0]

    # --- tile sizes ------------------------------------------------------
    # Token tile: large for MXU utilization, but don't over-pad tiny inputs.
    # Multiple of 16 keeps bf16 sublane packing happy (>= 8 needed for f32).
    tm = min(block_tokens, _round_up(tokens, 16))
    # Intermediate tile: multiple of 128 (lane width / MXU alignment).
    ti = min(block_inter, _round_up(inter, 128))

    tokens_pad = _round_up(tokens, tm)
    inter_pad = _round_up(inter, ti)
    n_tok_tiles = tokens_pad // tm
    n_i_tiles = inter_pad // ti

    # --- pad activations / weights (zeros are a no-op through SwiGLU) ----
    if tokens_pad != tokens:
        x2d = jnp.pad(x2d, ((0, tokens_pad - tokens), (0, 0)))
    wg = w_gate_t
    wu = w_up_t
    wd = w_down_t
    if inter_pad != inter:
        wg = jnp.pad(wg, ((0, 0), (0, inter_pad - inter)))
        wu = jnp.pad(wu, ((0, 0), (0, inter_pad - inter)))
        wd = jnp.pad(wd, ((0, inter_pad - inter), (0, 0)))

    # Fuse gate+up into one stacked weight per intermediate tile:
    #   wgu[k] = concat(gate_tile_k, up_tile_k) along the last axis.
    # (In a real model this prep would be done once at load time.)
    wg_r = wg.reshape(hidden, n_i_tiles, ti)
    wu_r = wu.reshape(hidden, n_i_tiles, ti)
    wgu = jnp.concatenate([wg_r, wu_r], axis=-1)          # [H, nI, 2*TI]
    wgu = jnp.transpose(wgu, (1, 0, 2))                   # [nI, H, 2*TI]

    # --- VMEM budget & cost estimate -------------------------------------
    itemsize = jnp.dtype(x.dtype).itemsize
    est = (
        2 * (tm * hidden * itemsize)                      # x (double-buffered)
        + 2 * (tm * hidden * itemsize)                    # out
        + 2 * (hidden * 2 * ti * itemsize)                # fused gate/up tile
        + 2 * (ti * hidden * itemsize)                    # down tile
        + tm * hidden * 4                                 # f32 accumulator
        + 3 * (tm * 2 * ti * 4)                           # gu / g*u / h intermediates
    )
    vmem_limit = int(min(max(2 * est, 32 * 1024 * 1024), 56 * 1024 * 1024))

    cost = pl.CostEstimate(
        flops=6 * tokens * hidden * inter,
        transcendentals=tokens * inter,
        bytes_accessed=(3 * hidden * inter + 2 * tokens * hidden) * itemsize,
    )

    kernel = functools.partial(_mlp_kernel, inter_tile=ti)

    out = pl.pallas_call(
        kernel,
        out_shape=jax.ShapeDtypeStruct((tokens_pad, hidden), x.dtype),
        grid_spec=pltpu.PrefetchScalarGridSpec(
            num_scalar_prefetch=0,
            grid=(n_tok_tiles, n_i_tiles),
            in_specs=[
                pl.BlockSpec((tm, hidden), lambda i, k: (i, 0)),
                pl.BlockSpec((None, hidden, 2 * ti), lambda i, k: (k, 0, 0)),
                pl.BlockSpec((ti, hidden), lambda i, k: (k, 0)),
            ],
            out_specs=pl.BlockSpec((tm, hidden), lambda i, k: (i, 0)),
            scratch_shapes=[pltpu.VMEM((tm, hidden), jnp.float32)],
        ),
        compiler_params=pltpu.CompilerParams(
            dimension_semantics=("parallel", "arbitrary"),
            vmem_limit_bytes=vmem_limit,
        ),
        cost_estimate=cost,
    )(x2d, wgu, wd)

    return out[:tokens].reshape(orig_shape)


def _reference(x, w_gate_t, w_up_t, w_down_t):
    g = x @ w_gate_t
    u = x @ w_up_t
    return (jax.nn.silu(g) * u) @ w_down_t


if __name__ == "__main__":
    # Small, TPU-friendly shapes consistent with the module's forward:
    #   batch=2, seq=8, hidden_size=128, intermediate_size=256
    batch, seq, hidden, inter = 2, 8, 128, 256

    key = jax.random.PRNGKey(0)
    kx, kg, ku, kd = jax.random.split(key, 4)

    x = jax.random.normal(kx, (batch, seq, hidden), dtype=jnp.float32)
    # Deterministic "Linear" weights (stored pre-transposed for the kernel).
    w_gate_t = jax.random.normal(kg, (hidden, inter), dtype=jnp.float32) * 0.02
    w_up_t = jax.random.normal(ku, (hidden, inter), dtype=jnp.float32) * 0.02
    w_down_t = jax.random.normal(kd, (inter, hidden), dtype=jnp.float32) * 0.02

    y = bailing_moe_mlp(x, w_gate_t, w_up_t, w_down_t)
    y = jax.block_until_ready(y)

    y_ref = _reference(x, w_gate_t, w_up_t, w_down_t)
    assert y.shape == (batch, seq, hidden)
    assert jnp.allclose(y, y_ref, atol=1e-4, rtol=1e-4), "mismatch vs reference"

    print("KERNEL_OK")
</pallas_src>

<mosaic_0001>
module attributes {stable_mosaic.version = 11 : i64} {
  func.func @_mlp_kernel(%arg0: i32, %arg1: i32, %arg2: memref<16x128xf32, #tpu.memory_space<vmem>>, %arg3: memref<1x128x512xf32, #tpu.memory_space<vmem>>, %arg4: memref<256x128xf32, #tpu.memory_space<vmem>>, %arg5: memref<16x128xf32, #tpu.memory_space<vmem>>, %arg6: memref<16x128xf32, #tpu.memory_space<vmem>>) attributes {dimension_semantics = [#tpu.dimension_semantics<parallel>, #tpu.dimension_semantics<arbitrary>], iteration_bounds = array<i64: 1, 1>, scalar_prefetch = 0 : i64, scratch_operands = 1 : i64, tpu.core_type = #tpu.core_type<tc>, window_params = [{transform_indices = @transform_0, window_bounds = array<i64: 16, 128>}, {transform_indices = @transform_1, window_bounds = array<i64: 1, 128, 512>}, {transform_indices = @transform_2, window_bounds = array<i64: 256, 128>}, {transform_indices = @transform_3, window_bounds = array<i64: 16, 128>}]} {
    %c0_i32 = arith.constant 0 : i32
    %0 = arith.cmpi eq, %arg1, %c0_i32 : i32
    %1 = arith.extui %0 : i1 to i32
    %c0_i32_0 = arith.constant 0 : i32
    %2 = arith.cmpi ne, %1, %c0_i32_0 : i32
    scf.if %2 {
      %cst_15 = arith.constant 0.000000e+00 : f32
      %24 = vector.broadcast %cst_15 : f32 to vector<16x128xf32>
      %c0_16 = arith.constant 0 : index
      %c0_17 = arith.constant 0 : index
      %25 = vector.load %arg6[%c0_16, %c0_17] : memref<16x128xf32, #tpu.memory_space<vmem>>, vector<16x128xf32>
      tpu.vector_store %arg6[%c0_16, %c0_17], %24 {strides = array<i32>} : memref<16x128xf32, #tpu.memory_space<vmem>>, vector<16x128xf32>,
    } else {
    }
    %c0 = arith.constant 0 : index
    %c0_1 = arith.constant 0 : index
    %3 = vector.load %arg2[%c0, %c0_1] : memref<16x128xf32, #tpu.memory_space<vmem>>, vector<16x128xf32>
    %c0_2 = arith.constant 0 : index
    %c0_3 = arith.constant 0 : index
    %c0_4 = arith.constant 0 : index
    %4 = vector.load %arg3[%c0_2, %c0_3, %c0_4] : memref<1x128x512xf32, #tpu.memory_space<vmem>>, vector<1x128x512xf32>
    %5 = vector.shape_cast %4 : vector<1x128x512xf32> to vector<128x512xf32>
    %cst = arith.constant dense<0.000000e+00> : vector<16x512xf32>
    %6 = tpu.matmul %3, %5, %cst {dimension_numbers = #tpu.dot_dimension_numbers<[1], [0], [0], [1], [0, 0, 1, 1], [], []>} : vector<16x128xf32>, vector<128x512xf32>, vector<16x512xf32> -> vector<16x512xf32>
    %7 = vector.extract_strided_slice %6 {offsets = [0, 0], sizes = [16, 256], strides = [1, 1]} : vector<16x512xf32> to vector<16x256xf32>
    %8 = vector.extract_strided_slice %6 {offsets = [0, 256], sizes = [16, 256], strides = [1, 1]} : vector<16x512xf32> to vector<16x256xf32>
    %9 = arith.negf %7 : vector<16x256xf32>
    %10 = math.exp %9 : vector<16x256xf32>
    %cst_5 = arith.constant 1.000000e+00 : f32
    %11 = vector.broadcast %cst_5 : f32 to vector<16x256xf32>
    %12 = arith.addf %11, %10 : vector<16x256xf32>
    %13 = arith.divf %11, %12 : vector<16x256xf32>
    %14 = arith.mulf %7, %13 : vector<16x256xf32>
    %15 = arith.mulf %14, %8 : vector<16x256xf32>
    %c0_6 = arith.constant 0 : index
    %c0_7 = arith.constant 0 : index
    %16 = vector.load %arg6[%c0_6, %c0_7] : memref<16x128xf32, #tpu.memory_space<vmem>>, vector<16x128xf32>
    %c0_8 = arith.constant 0 : index
    %c0_9 = arith.constant 0 : index
    %17 = vector.load %arg4[%c0_8, %c0_9] : memref<256x128xf32, #tpu.memory_space<vmem>>, vector<256x128xf32>
    %cst_10 = arith.constant dense<0.000000e+00> : vector<16x128xf32>
    %18 = tpu.matmul %15, %17, %cst_10 {dimension_numbers = #tpu.dot_dimension_numbers<[1], [0], [0], [1], [0, 0, 1, 1], [], []>} : vector<16x256xf32>, vector<256x128xf32>, vector<16x128xf32> -> vector<16x128xf32>
    %19 = arith.addf %16, %18 : vector<16x128xf32>
    %c0_11 = arith.constant 0 : index
    %c0_12 = arith.constant 0 : index
    %20 = vector.load %arg6[%c0_11, %c0_12] : memref<16x128xf32, #tpu.memory_space<vmem>>, vector<16x128xf32>
    tpu.vector_store %arg6[%c0_11, %c0_12], %19 {strides = array<i32>} : memref<16x128xf32, #tpu.memory_space<vmem>>, vector<16x128xf32>,
    %c0_i32_13 = arith.constant 0 : i32
    %21 = arith.cmpi eq, %arg1, %c0_i32_13 : i32
    %22 = arith.extui %21 : i1 to i32
    %c0_i32_14 = arith.constant 0 : i32
    %23 = arith.cmpi ne, %22, %c0_i32_14 : i32
    scf.if %23 {
      %c0_15 = arith.constant 0 : index
      %c0_16 = arith.constant 0 : index
      %24 = vector.load %arg6[%c0_15, %c0_16] : memref<16x128xf32, #tpu.memory_space<vmem>>, vector<16x128xf32>
      %c0_17 = arith.constant 0 : index
      %c0_18 = arith.constant 0 : index
      %25 = vector.load %arg5[%c0_17, %c0_18] : memref<16x128xf32, #tpu.memory_space<vmem>>, vector<16x128xf32>
      tpu.vector_store %arg5[%c0_17, %c0_18], %24 {strides = array<i32>} : memref<16x128xf32, #tpu.memory_space<vmem>>, vector<16x128xf32>,
    } else {
    }
    return
  }
  func.func @transform_0(%arg0: i32, %arg1: i32) -> (i32, i32) {
    %c0_i32 = arith.constant 0 : i32
    %c0_i32_0 = arith.constant 0 : i32
    return %arg0, %c0_i32 : i32, i32
  }
  func.func @transform_1(%arg0: i32, %arg1: i32) -> (i32, i32, i32) {
    %c0_i32 = arith.constant 0 : i32
    %c0_i32_0 = arith.constant 0 : i32
    %c0_i32_1 = arith.constant 0 : i32
    return %arg1, %c0_i32, %c0_i32_0 : i32, i32, i32
  }
  func.func @transform_2(%arg0: i32, %arg1: i32) -> (i32, i32) {
    %c0_i32 = arith.constant 0 : i32
    %c0_i32_0 = arith.constant 0 : i32
    return %arg1, %c0_i32 : i32, i32
  }
  func.func @transform_3(%arg0: i32, %arg1: i32) -> (i32, i32) {
    %c0_i32 = arith.constant 0 : i32
    %c0_i32_0 = arith.constant 0 : i32
    return %arg0, %c0_i32 : i32, i32
  }
}

</mosaic_0001>

<bundles_post_ra>
// kernel: bailing_moe_mlp.1
= control target key start
LH: loop header
LB: loop body
LE: loop exit
PB: predicated region body
PF: predicated region fallthrough
CT: control target
= control target key end

     0   :  { %v607_v7 = vmov 0.0   ;;  %s941_s0 = inlined_call_operand.vmem [shape: f32[16,128], index: 0, kind: input, shape index: {}]   ;;  %s942_s1 = inlined_call_operand.vmem [shape: f32[1,128,512], index: 1, kind: input, shape index: {}]   ;;  %s943_s2 = inlined_call_operand.vmem [shape: f32[256,128], index: 2, kind: input, shape index: {}]   ;;  %s944_s3 = inlined_call_operand.hbm [shape: f32[16,128], index: 3, kind: output, shape index: {}]  }
   0x1   :  { %v24_v0 = vld [vmem:[%s942_s1 + $0x8] sm:$0xff]  ;;  %v23_v2 = vld [vmem:[%s942_s1] sm:$0xff]  ;;  %151 = vmatprep.mubr.f32.mxu0 %v607_v7  ;;  %228 = vmatprep.mubr.f32.mxu1 %v607_v7  ;;  %v26_v24 = vld [vmem:[%s942_s1 + $0x18] sm:$0xff] }
   0x2   :  { %v28_v1 = vld [vmem:[%s942_s1 + $0x28] sm:$0xff]  ;;  %v27_v4 = vld [vmem:[%s942_s1 + $0x20] sm:$0xff]  ;;  %v30_v25 = vld [vmem:[%s942_s1 + $0x38] sm:$0xff] }
   0x3   :  { %v451_v3 = vpack.c.bf16 %v28_v1, %v24_v0  ;;  %v32_v5 = vld [vmem:[%s942_s1 + $0x48] sm:$0xff]  ;;  %v453_v8 = vpack.c.bf16 %v27_v4, %v23_v2  ;;  %v31_v10 = vld [vmem:[%s942_s1 + $0x40] sm:$0xff]  ;;  %v483_v28 = vpack.c.bf16 %v30_v25, %v26_v24  ;;  %v25_v29 = vld [vmem:[%s942_s1 + $0x10] sm:$0xff] }
   0x4   :  { %v36_v6 = vld [vmem:[%s942_s1 + $0x68] sm:$0xff]  ;;  %v35_v11 = vld [vmem:[%s942_s1 + $0x60] sm:$0xff]  ;;  %v29_v31 = vld [vmem:[%s942_s1 + $0x30] sm:$0xff] }
   0x5   :  { %v455_v9 = vpack.c.bf16 %v36_v6, %v32_v5  ;;  %v40_v12 = vld [vmem:[%s942_s1 + $0x88] sm:$0xff]  ;;  %452 = vmatprep.subr.bf16.mxu0 %v451_v3  ;;  %v457_v14 = vpack.c.bf16 %v35_v11, %v31_v10  ;;  %v39_v16 = vld [vmem:[%s942_s1 + $0x80] sm:$0xff]  ;;  %484 = vmatprep.subr.bf16.mxu1 %v483_v28  ;;  %v485_v34 = vpack.c.bf16 %v29_v31, %v25_v29  ;;  %v34_v35 = vld [vmem:[%s942_s1 + $0x58] sm:$0xff] }
   0x6   :  { %v44_v13 = vld [vmem:[%s942_s1 + $0xa8] sm:$0xff]  ;;  %454 = vmatpush1.bf16.msra.mxu0 %v453_v8  ;;  %v43_v17 = vld [vmem:[%s942_s1 + $0xa0] sm:$0xff]  ;;  %v38_v36 = vld [vmem:[%s942_s1 + $0x78] sm:$0xff] }
   0x7   :  { %456 = vmatprep.subr.bf16.mxu0 %v455_v9  ;;  %v459_v15 = vpack.c.bf16 %v44_v13, %v40_v12  ;;  %v48_v18 = vld [vmem:[%s942_s1 + $0xc8] sm:$0xff]  ;;  %v461_v20 = vpack.c.bf16 %v43_v17, %v39_v16  ;;  %v47_v21 = vld [vmem:[%s942_s1 + $0xc0] sm:$0xff]  ;;  %v487_v38 = vpack.c.bf16 %v38_v36, %v34_v35  ;;  %v33_v39 = vld [vmem:[%s942_s1 + $0x50] sm:$0xff]  ;;  %486 = vmatpush1.bf16.msra.mxu1 %v485_v34 }
   0x8   :  { %v52_v19 = vld [vmem:[%s942_s1 + $0xe8] sm:$0xff]  ;;  %v51_v23 = vld [vmem:[%s942_s1 + $0xe0] sm:$0xff]  ;;  %v37_v40 = vld [vmem:[%s942_s1 + $0x70] sm:$0xff] }
   0x9   :  { %v463_v22 = vpack.c.bf16 %v52_v19, %v48_v18  ;;  %v56_v26 = vld [vmem:[%s942_s1 + $0x108] sm:$0xff]  ;;  %v55_v30 = vld [vmem:[%s942_s1 + $0x100] sm:$0xff]  ;;  %v465_v32 = vpack.c.bf16 %v51_v23, %v47_v21  ;;  %v42_v41 = vld [vmem:[%s942_s1 + $0x98] sm:$0xff]  ;;  %v489_v44 = vpack.c.bf16 %v37_v40, %v33_v39  ;;  %488 = vmatprep.subr.bf16.mxu1 %v487_v38 }
   0xa   :  { %458 = vmatpush1.bf16.msra.mxu0 %v457_v14  ;;  %v60_v27 = vld [vmem:[%s942_s1 + $0x128] sm:$0xff]  ;;  %v59_v33 = vld [vmem:[%s942_s1 + $0x120] sm:$0xff]  ;;  %v46_v45 = vld [vmem:[%s942_s1 + $0xb8] sm:$0xff] }
   0xb   :  { %460 = vmatprep.subr.bf16.mxu0 %v459_v15  ;;  %v467_v37 = vpack.c.bf16 %v60_v27, %v56_v26  ;;  %v64_v42 = vld [vmem:[%s942_s1 + $0x148] sm:$0xff]  ;;  %v491_v46 = vpack.c.bf16 %v46_v45, %v42_v41  ;;  %v41_v47 = vld [vmem:[%s942_s1 + $0x90] sm:$0xff]  ;;  %v469_v49 = vpack.c.bf16 %v59_v33, %v55_v30  ;;  %v50_v50 = vld [vmem:[%s942_s1 + $0xd8] sm:$0xff]  ;;  %490 = vmatpush1.bf16.msra.mxu1 %v489_v44 }
   0xc   :  { %v68_v43 = vld [vmem:[%s942_s1 + $0x168] sm:$0xff]  ;;  %v45_v48 = vld [vmem:[%s942_s1 + $0xb0] sm:$0xff]  ;;  %v54_v51 = vld [vmem:[%s942_s1 + $0xf8] sm:$0xff] }
   0xd   :  { %v471_v52 = vpack.c.bf16 %v68_v43, %v64_v42  ;;  %v63_v53 = vld [vmem:[%s942_s1 + $0x140] sm:$0xff]  ;;  %v72_v55 = vld [vmem:[%s942_s1 + $0x188] sm:$0xff]  ;;  %v493_v57 = vpack.c.bf16 %v45_v48, %v41_v47  ;;  %492 = vmatprep.subr.bf16.mxu1 %v491_v46  ;;  %v495_v58 = vpack.c.bf16 %v54_v51, %v50_v50  ;;  %v49_v59 = vld [vmem:[%s942_s1 + $0xd0] sm:$0xff] }
   0xe   :  { %462 = vmatpush1.bf16.msra.mxu0 %v461_v20  ;;  %v67_v54 = vld [vmem:[%s942_s1 + $0x160] sm:$0xff]  ;;  %v76_v56 = vld [vmem:[%s942_s1 + $0x1a8] sm:$0xff]  ;;  %v53_v60 = vld [vmem:[%s942_s1 + $0xf0] sm:$0xff] }
   0xf   :  { %464 = vmatprep.subr.bf16.mxu0 %v463_v22  ;;  %v473_v61 = vpack.c.bf16 %v67_v54, %v63_v53  ;;  %v58_v62 = vld [vmem:[%s942_s1 + $0x118] sm:$0xff]  ;;  %v475_v0 = vpack.c.bf16 %v76_v56, %v72_v55  ;;  %v71_v1 = vld [vmem:[%s942_s1 + $0x180] sm:$0xff]  ;;  %v80_v3 = vld [vmem:[%s942_s1 + $0x1c8] sm:$0xff]  ;;  %494 = vmatpush1.bf16.msra.mxu1 %v493_v57  ;;  %v497_v5 = vpack.c.bf16 %v53_v60, %v49_v59 }
  0x10   :  { %v62_v63 = vld [vmem:[%s942_s1 + $0x138] sm:$0xff]  ;;  %v75_v2 = vld [vmem:[%s942_s1 + $0x1a0] sm:$0xff]  ;;  %v84_v4 = vld [vmem:[%s942_s1 + $0x1e8] sm:$0xff] }
  0x12   :  { %466 = vmatpush1.bf16.msra.mxu0 %v465_v32 }
  0x13   :  { %468 = vmatprep.subr.bf16.mxu0 %v467_v37 }
  0x16   :  { %470 = vmatpush1.bf16.msra.mxu0 %v469_v49 }
  0x17   :  { %472 = vmatprep.subr.bf16.mxu0 %v471_v52 }
  0x18   :  { %8 = vsyncpa [#allocation4], 0  ;;  %496 = vmatprep.subr.bf16.mxu1 %v495_v58  ;;  %v499_v6 = vpack.c.bf16 %v62_v63, %v58_v62  ;;  %v57_v8 = vld [vmem:[%s942_s1 + $0x110] sm:$0xff]  ;;  %v477_v10 = vpack.c.bf16 %v75_v2, %v71_v1  ;;  %v66_v11 = vld [vmem:[%s942_s1 + $0x158] sm:$0xff]  ;;  %v479_v13 = vpack.c.bf16 %v84_v4, %v80_v3 }
  0x19   :  { %v61_v9 = vld [vmem:[%s942_s1 + $0x130] sm:$0xff]  ;;  %v70_v12 = vld [vmem:[%s942_s1 + $0x178] sm:$0xff]  ;;  %v79_v14 = vld [vmem:[%s942_s1 + $0x1c0] sm:$0xff]  ;;  %498 = vmatpush1.bf16.msra.mxu1 %v497_v5 }
  0x1a   :  { %474 = vmatpush1.bf16.msra.mxu0 %v473_v61  ;;  %v83_v15 = vld [vmem:[%s942_s1 + $0x1e0] sm:$0xff]  ;;  %v501_v16 = vpack.c.bf16 %v61_v9, %v57_v8  ;;  %500 = vmatprep.subr.bf16.mxu1 %v499_v6  ;;  %v503_v17 = vpack.c.bf16 %v70_v12, %v66_v11  ;;  %v65_v18 = vld [vmem:[%s942_s1 + $0x150] sm:$0xff]  ;;  %v74_v21 = vld [vmem:[%s942_s1 + $0x198] sm:$0xff] }
  0x1b   :  { %476 = vmatprep.subr.bf16.mxu0 %v475_v0  ;;  %v69_v19 = vld [vmem:[%s942_s1 + $0x170] sm:$0xff]  ;;  %v481_v20 = vpack.c.bf16 %v83_v15, %v79_v14  ;;  %v78_v22 = vld [vmem:[%s942_s1 + $0x1b8] sm:$0xff]  ;;  %v21_v27 = vld [vmem:[%s941_s0] sm:$0xff] }
  0x1c   :  { %v505_v23 = vpack.c.bf16 %v69_v19, %v65_v18  ;;  %v507_v24 = vpack.c.bf16 %v78_v22, %v74_v21  ;;  %v73_v25 = vld [vmem:[%s942_s1 + $0x190] sm:$0xff]  ;;  %v82_v28 = vld [vmem:[%s942_s1 + $0x1d8] sm:$0xff]  ;;  %v22_v34 = vld [vmem:[%s941_s0 + $0x8] sm:$0xff] }
  0x1d   :  { %502 = vmatpush1.bf16.msra.mxu1 %v501_v16  ;;  %v77_v26 = vld [vmem:[%s942_s1 + $0x1b0] sm:$0xff]  ;;  %v86_v29 = vld [vmem:[%s942_s1 + $0x1f8] sm:$0xff]  ;;  %v291_v36 = vld [vmem:[%s943_s2 + $0x80] sm:$0xff] }
  0x1e   :  { %478 = vmatpush1.bf16.msra.mxu0 %v477_v10  ;;  %504 = vmatprep.subr.bf16.mxu1 %v503_v17  ;;  %v509_v30 = vpack.c.bf16 %v77_v26, %v73_v25  ;;  %v511_v31 = vpack.c.bf16 %v86_v29, %v82_v28  ;;  %v81_v32 = vld [vmem:[%s942_s1 + $0x1d0] sm:$0xff]  ;;  %v292_v37 = vld [vmem:[%s943_s2 + $0x88] sm:$0xff]  ;;  %v275_v39 = vld [vmem:[%s943_s2] sm:$0xff] }
  0x1f   :  { %480 = vmatprep.subr.bf16.mxu0 %v479_v13  ;;  %v85_v33 = vld [vmem:[%s942_s1 + $0x1f0] sm:$0xff]  ;;  %v515_v38 = vpack.c.bf16 %v292_v37, %v291_v36  ;;  %v276_v40 = vld [vmem:[%s943_s2 + $0x8] sm:$0xff]  ;;  %v294_v42 = vld [vmem:[%s943_s2 + $0x98] sm:$0xff] }
  0x20   :  { %v513_v35 = vpack.c.bf16 %v85_v33, %v81_v32  ;;  %v517_v41 = vpack.c.bf16 %v276_v40, %v275_v39  ;;  %v277_v44 = vld [vmem:[%s943_s2 + $0x10] sm:$0xff]  ;;  %v278_v45 = vld [vmem:[%s943_s2 + $0x18] sm:$0xff]  ;;  %v295_v47 = vld [vmem:[%s943_s2 + $0xa0] sm:$0xff] }
  0x21   :  { %506 = vmatpush1.bf16.msra.mxu1 %v505_v23  ;;  %v521_v46 = vpack.c.bf16 %v278_v45, %v277_v44  ;;  %v296_v48 = vld [vmem:[%s943_s2 + $0xa8] sm:$0xff]  ;;  %v279_v50 = vld [vmem:[%s943_s2 + $0x20] sm:$0xff]  ;;  %v297_v53 = vld [vmem:[%s943_s2 + $0xb0] sm:$0xff] }
  0x22   :  { %482 = vmatpush1.bf16.msra.mxu0 %v481_v20  ;;  %508 = vmatprep.subr.bf16.mxu1 %v507_v24  ;;  %v523_v49 = vpack.c.bf16 %v296_v48, %v295_v47  ;;  %v280_v51 = vld [vmem:[%s943_s2 + $0x28] sm:$0xff]  ;;  %v298_v54 = vld [vmem:[%s943_s2 + $0xb8] sm:$0xff]  ;;  %v281_v56 = vld [vmem:[%s943_s2 + $0x30] sm:$0xff] }
  0x23   :  { %516 = vmatprep.subr.bf16.mxu0 %v515_v38  ;;  %v525_v52 = vpack.c.bf16 %v280_v51, %v279_v50  ;;  %v527_v55 = vpack.c.bf16 %v298_v54, %v297_v53  ;;  %v282_v57 = vld [vmem:[%s943_s2 + $0x38] sm:$0xff]  ;;  %v299_v59 = vld [vmem:[%s943_s2 + $0xc0] sm:$0xff]  ;;  %v300_v60 = vld [vmem:[%s943_s2 + $0xc8] sm:$0xff] }
  0x24   :  { %v529_v58 = vpack.c.bf16 %v282_v57, %v281_v56  ;;  %v531_v61 = vpack.c.bf16 %v300_v60, %v299_v59  ;;  %v283_v62 = vld [vmem:[%s943_s2 + $0x40] sm:$0xff]  ;;  %v284_v63 = vld [vmem:[%s943_s2 + $0x48] sm:$0xff]  ;;  %v301_v1 = vld [vmem:[%s943_s2 + $0xd0] sm:$0xff] }
  0x25   :  { %152 = vmatmul.mubr.f32.vlgmr.msra.gmra.mrb[0].mxu0 %v21_v27  ;;  %510 = vmatpush1.bf16.msra.mxu1 %v509_v30  ;;  %v533_v0 = vpack.c.bf16 %v284_v63, %v283_v62  ;;  %v302_v2 = vld [vmem:[%s943_s2 + $0xd8] sm:$0xff]  ;;  %v285_v4 = vld [vmem:[%s943_s2 + $0x50] sm:$0xff]  ;;  %v303_v8 = vld [vmem:[%s943_s2 + $0xe0] sm:$0xff] }
  0x26   :  { %157 = vmatprep.mubr.f32.mxu0 %v607_v7  ;;  %512 = vmatprep.subr.bf16.mxu1 %v511_v31  ;;  %v535_v3 = vpack.c.bf16 %v302_v2, %v301_v1  ;;  %v286_v5 = vld [vmem:[%s943_s2 + $0x58] sm:$0xff]  ;;  %v304_v9 = vld [vmem:[%s943_s2 + $0xe8] sm:$0xff]  ;;  %v287_v11 = vld [vmem:[%s943_s2 + $0x60] sm:$0xff] }
  0x27   :  { %518 = vmatpush3.bf16.msra.mxu0 %v517_v41  ;;  %v537_v6 = vpack.c.bf16 %v286_v5, %v285_v4  ;;  %v539_v10 = vpack.c.bf16 %v304_v9, %v303_v8  ;;  %v288_v12 = vld [vmem:[%s943_s2 + $0x68] sm:$0xff]  ;;  %v305_v14 = vld [vmem:[%s943_s2 + $0xf0] sm:$0xff]  ;;  %v306_v15 = vld [vmem:[%s943_s2 + $0xf8] sm:$0xff] }
  0x28   :  { %v541_v13 = vpack.c.bf16 %v288_v12, %v287_v11  ;;  %v543_v16 = vpack.c.bf16 %v306_v15, %v305_v14  ;;  %v289_v17 = vld [vmem:[%s943_s2 + $0x70] sm:$0xff]  ;;  %v290_v18 = vld [vmem:[%s943_s2 + $0x78] sm:$0xff] }
  0x29   :  { %158 = vmatmul.mubr.f32.gmra.mrb[2].mxu0 %v22_v34  ;;  %514 = vmatpush1.bf16.msra.mxu1 %v513_v35  ;;  %v545_v19 = vpack.c.bf16 %v290_v18, %v289_v17 }
  0x2a   :  { %547 = vmatprep.subr.bf16.mxu1 %v515_v38 }
  0x2c   :  { %229 = vmatmul.mubr.f32.vlgmr.msra.gmra.mrb[0].mxu1 %v21_v27 }
  0x2d   :  { %234 = vmatprep.mubr.f32.mxu1 %v607_v7  ;;  %v293_v7 = vld [vmem:[%s943_s2 + $0x90] sm:$0xff]  ;;  %555 = vmatpush3.bf16.msra.mxu1 %v517_v41  ;;  %s608_s2 = smov [#allocation3]  }
  0x2e   :  { %v519_v43 = vpack.c.bf16 %v294_v42, %v293_v7  ;;  %s398_s13 = sshll.u32 %s608_s2, 4  ;;  %s399_s13 = int_to_ptr.vmem [resolvable:$true] %s398_s13 }
  0x2f   :  { %s583_s14 = scalar_lea.vmem %s399_s13, 256  ;;  %p588_p1 = scmp.lt.s32.totalorder %s399_s13, %s399_s13 }
  0x30   :  { %235 = vmatmul.mubr.f32.gmra.mrb[2].mxu1 %v22_v34  ;;  %520 = vmatprep.subr.bf16.mxu0 %v519_v43  ;;  %p584_p0 = scmp.ne.s32.totalorder %s399_s13, %s583_s14  ;;  %p589_p2 = scmp.lt.s32.totalorder %s583_s14, %s583_s14 }
  0x31   :  { %548 = vmatprep.subr.bf16.mxu1 %v519_v43  ;;  %522 = vmatpush3.bf16.msra.mxu0 %v521_v46 }
  0x32   :  { %556 = vmatpush3.bf16.msra.mxu1 %v521_v46  ;;  %524 = vmatprep.subr.bf16.mxu0 %v523_v49  ;;  %p590_p3 = por %p589_p2, %p588_p1 }
  0x33   :  { %549 = vmatprep.subr.bf16.mxu1 %v523_v49 }
  0x34   :  { %p591_p4 = pnand %p590_p3, %p584_p0 }
  0x35   :  { %526 = vmatpush3.bf16.msra.mxu0 %v525_v52 }
  0x36   :  { %557 = vmatpush3.bf16.msra.mxu1 %v525_v52  ;;  %528 = vmatprep.subr.bf16.mxu0 %v527_v55 }
  0x37   :  { %550 = vmatprep.subr.bf16.mxu1 %v527_v55 }
  0x39   :  { %530 = vmatpush3.bf16.msra.mxu0 %v529_v58 }
  0x3a   :  { %558 = vmatpush3.bf16.msra.mxu1 %v529_v58  ;;  %532 = vmatprep.subr.bf16.mxu0 %v531_v61 }
  0x3b   :  { %551 = vmatprep.subr.bf16.mxu1 %v531_v61 }
  0x3d   :  { %534 = vmatpush3.bf16.msra.mxu0 %v533_v0 }
  0x3e   :  { %559 = vmatpush3.bf16.msra.mxu1 %v533_v0  ;;  %536 = vmatprep.subr.bf16.mxu0 %v535_v3 }
  0x3f   :  { %552 = vmatprep.subr.bf16.mxu1 %v535_v3 }
  0x41   :  { %538 = vmatpush3.bf16.msra.mxu0 %v537_v6 }
  0x42   :  { %560 = vmatpush3.bf16.msra.mxu1 %v537_v6  ;;  %540 = vmatprep.subr.bf16.mxu0 %v539_v10 }
  0x43   :  { %553 = vmatprep.subr.bf16.mxu1 %v539_v10 }
  0x45   :  { %542 = vmatpush3.bf16.msra.mxu0 %v541_v13 }
  0x46   :  { %561 = vmatpush3.bf16.msra.mxu1 %v541_v13  ;;  %544 = vmatprep.subr.bf16.mxu0 %v543_v16 }
  0x47   :  { %554 = vmatprep.subr.bf16.mxu1 %v543_v16 }
  0x49   :  { %546 = vmatpush3.bf16.msra.mxu0 %v545_v19 }
  0x4a   :  { %562 = vmatpush3.bf16.msra.mxu1 %v545_v19 }
  0xf8   :  { %v153_v20 = vpop.f32.mrb[0].mxu0 }
  0xf9   :  { %v409_v21 = vmul.f32 -1.442695, %v153_v20  ;;  %v155_v22 = vpop.f32.mrb[1].mxu0 }
  0xfa   :  { %v410_v23 = vmul.f32 -1.442695, %v155_v22 }
  0xfb   :  { %567 = vpow2.f32 %v409_v21 }
  0xfc   :  { %569 = vpow2.f32 %v410_v23  ;;  %v159_v24 = vpop.f32.mrb[2].mxu0 }
  0xfd   :  { %v411_v25 = vmul.f32 -1.442695, %v159_v24  ;;  %v161_v26 = vpop.f32.mrb[3].mxu0 }
  0xfe   :  { %v412_v27 = vmul.f32 -1.442695, %v161_v26 }
  0xff   :  { %571 = vpow2.f32 %v411_v25  ;;  %v230_v28 = vpop.f32.mrb[0].mxu1 }
 0x100   :  { %573 = vpow2.f32 %v412_v27  ;;  %v232_v29 = vpop.f32.mrb[1].mxu1 }
 0x103   :  { %v236_v33 = vpop.f32.mrb[2].mxu1 }
 0x104   :  { %v238_v35 = vpop.f32.mrb[3].mxu1 }
 0x105   :  { %v568_v30 = vpop.eup %567 }
 0x106   :  { %v570_v31 = vpop.eup %569  ;;  %v253_v32 = vadd.f32 1.0, %v568_v30 }
 0x107   :  { %v254_v34 = vadd.f32 1.0, %v570_v31 }
 0x108   :  { %575 = vrcp.f32 %v253_v32 }
 0x109   :  { %v572_v36 = vpop.eup %571  ;;  %577 = vrcp.f32 %v254_v34 }
 0x10a   :  { %v574_v37 = vpop.eup %573  ;;  %v255_v38 = vadd.f32 1.0, %v572_v36 }
 0x10b   :  { %v256_v39 = vadd.f32 1.0, %v574_v37 }
 0x10c   :  { %579 = vrcp.f32 %v255_v38 }
 0x10d   :  { %581 = vrcp.f32 %v256_v39 }
 0x112   :  { %v576_v40 = vpop.eup %575 }
 0x113   :  { %v578_v41 = vpop.eup %577  ;;  %v265_v7 = vmul.f32 %v576_v40, %v153_v20 }
 0x114   :  { %v266_v42 = vmul.f32 %v578_v41, %v155_v22 }
 0x115   :  { %v269_v43 = vmul.f32 %v265_v7, %v230_v28 }
 0x116   :  { %v580_v44 = vpop.eup %579  ;;  %v270_v45 = vmul.f32 %v266_v42, %v232_v29 }
 0x117   :  { %v582_v46 = vpop.eup %581  ;;  %v267_v47 = vmul.f32 %v580_v44, %v159_v24 }
 0x118   :  { %v268_v48 = vmul.f32 %v582_v46, %v161_v26  ;;  %371 = vmatprep.mubr.f32.mxu0 %v270_v45 }
 0x119   :  { %v271_v49 = vmul.f32 %v267_v47, %v236_v33  ;;  %372 = vmatmul.mubr.f32.vlgmr.msra.gmra.mrb[4].mxu0 %v269_v43 }
 0x11a   :  { %v272_v50 = vmul.f32 %v268_v48, %v238_v35 }
 0x11c   :  { %376 = vmatprep.mubr.f32.mxu1 %v272_v50 }
 0x11d   :  { %377 = vmatmul.mubr.f32.vlgmr.msra.gmra.mrb[4].mxu1 %v271_v49 }
 0x1ec   :  { %v445_v51 = vpop.f32.mrb[4].mxu0 }
 0x1ed   :  { %v446_v52 = vpop.f32.mrb[5].mxu0 }
 0x1ee   :  { %v447_v53 = vadd.f32 %v446_v52, %v445_v51 }
 0x1f0   :  { %391 = vst [vmem:[#allocation3] sm:$0xff] %v447_v53  ;;  %v448_v54 = vpop.f32.mrb[4].mxu1 }
 0x1f1   :  { %v449_v55 = vpop.f32.mrb[5].mxu1 }
 0x1f2   :  { %v450_v56 = vadd.f32 %v449_v55, %v448_v54 }
 0x1f4   :  { %392 = vst [vmem:[#allocation3 + $0x8] sm:$0xff] %v450_v56 }
 0x1f5   :  { %594 = shalt.err (!%p591_p4)
}
 0x1f6   :  { %s595_s17 = scalar_lea.hbm %s944_s3, 256 }
 0x1f7   :  { %p596_p5 = scmp.ne.s32.totalorder %s944_s3, %s595_s17  ;;  %p599_p6 = scmp.lt.u32.totalorder %s595_s17, %s944_s3 }
 0x1f9   :  { %p601_p7 = pnand %p599_p6, %p596_p5 }
 0x1fb   :  { %604 = shalt.err (!%p601_p7)
}
 0x1fc   :  { %s609_s22 = smov 128   ;;  %s610_s23 = smov 8  }
 0x1fd   :  { %404 = dma.vmem_to_hbm [thread:$0]  %s399_s13, 256, %s944_s3, [#allocation4], %s609_s22, %s609_s22, %s610_s23  }
 0x1fe   :  { %605 = dma.done.wait [#allocation4], 256  }
 0x1ff   :  { %606 = vsyncadd [#allocation4], 4294967040 }
 0x200   :  { %408 = vsyncpa [#allocation4], 1 }

</bundles_post_ra>
